<compile_context>
chip_gen: v5e
topology: v5e:2x2
jax: 0.10.0
libtpu: 0.0.40
codegen_flags: <defaults>
</compile_context>

<pallas_src>
import jax
import jax.numpy as jnp
from jax.experimental import pallas as pl
from jax.experimental.pallas import tpu as pltpu

EPS = 1e-5
DEFAULT_TILE_B = 2048   # max batch tile (per-grid-step overhead dominates tiny matmuls)


def _round_up(x, m):
    return (x + m - 1) // m * m


def _cdiv(a, b):
    return (a + b - 1) // b


def _bn_scale_shift(gamma, beta, mean, var):
    # Eval-mode BN as an affine transform: y = x * s + t
    s = gamma * jax.lax.rsqrt(var + EPS)
    t = beta - mean * s
    return s, t


# -----------------------------------------------------------------------------
# Offline param folding (run once, outside the kernel / hot path)
# -----------------------------------------------------------------------------
def prepare_fused_params(params):
    emb_tables = params["emb_tables"]
    n_emb = sum(t.shape[1] for t in emb_tables)

    w1, b1 = params["w1"], params["b1"]
    w1_emb, w1_cont = w1[:n_emb], w1[n_emb:]

    # bn_cont folded into the continuous-feature rows of w1 and into b1.
    s_c, t_c = _bn_scale_shift(params["bn_cont_g"], params["bn_cont_b"],
                               params["bn_cont_m"], params["bn_cont_v"])
    w1c = s_c.reshape(-1, 1) * w1_cont                    # (n_cont, h1)
    b1f = b1 + t_c @ w1_cont                              # (1, h1)

    # Embedding tables folded through the embedding rows of w1 into ONE stacked
    # table indexed by a "global" category id; b1 appended as an always-hot row.
    rows, offsets = [], []
    row_off, col_off = 0, 0
    for tbl in emb_tables:
        n_cat_i, nf = tbl.shape
        rows.append(tbl @ w1_emb[col_off:col_off + nf])   # (n_cat_i, h1)
        offsets.append(row_off)
        row_off += n_cat_i
        col_off += nf
    bias_row = row_off                                    # always-hot b1 row index
    rows.append(b1f)
    t_emb = jnp.concatenate(rows, axis=0)                 # (sum n_cat + 1, h1)
    n_rows = _round_up(t_emb.shape[0], 8)
    t_emb = jnp.pad(t_emb, ((0, n_rows - t_emb.shape[0]), (0, 0)))

    # BN1 folded into w2/b2.
    s1, t1 = _bn_scale_shift(params["bn1_g"], params["bn1_b"],
                             params["bn1_m"], params["bn1_v"])
    w2f = s1.reshape(-1, 1) * params["w2"]
    b2f = params["b2"] + t1 @ params["w2"]

    # BN2 folded into w3/b3 (kept at the true out_sz width — narrow output).
    s2, t2 = _bn_scale_shift(params["bn2_g"], params["bn2_b"],
                             params["bn2_m"], params["bn2_v"])
    w3f = s2.reshape(-1, 1) * params["w3"]
    b3f = params["b3"] + t2 @ params["w3"]

    return dict(
        t_emb=t_emb,
        emb_offsets=jnp.asarray(offsets, jnp.int32),
        bias_row=int(bias_row),
        n_cat=len(emb_tables),
        w1c=w1c, w2=w2f, b2=b2f, w3=w3f, b3=b3f,
        out_sz=int(w3f.shape[1]),
    )


# -----------------------------------------------------------------------------
# Fused kernel: embedding gather + 3-layer MLP (BN + b1 pre-folded)
# -----------------------------------------------------------------------------
def _make_kernel(n_cat, bias_row):
    def kernel(x_ref, t_emb_ref, w1c_ref, w2_ref, b2_ref, w3_ref, b3_ref, out_ref):
        tile_b = x_ref.shape[0]
        n_rows = t_emb_ref.shape[0]

        x = x_ref[...]                              # (tile_b, n_cat + n_cont) f32
        ids = x[:, :n_cat].astype(jnp.int32)        # global category ids (offsets folded)
        cont = x[:, n_cat:]                         # continuous features

        # Multi-hot rows: 1s at each global category id + the always-hot b1 row.
        lanes = jax.lax.broadcasted_iota(jnp.int32, (tile_b, n_rows), 1)
        mh = lanes == bias_row
        for j in range(n_cat):
            mh = mh | (lanes == ids[:, j:j + 1])
        mh = mh.astype(jnp.float32)

        # Layer 1: embedding-part matmul (b1 included via bias row) + continuous
        # part, then ReLU.
        h = jnp.dot(mh, t_emb_ref[...], preferred_element_type=jnp.float32)
        h = h + jnp.dot(cont, w1c_ref[...], preferred_element_type=jnp.float32)
        h = jnp.maximum(h, 0.0)

        # Layer 2 (BN1 folded into w2/b2): Linear -> ReLU.
        h = jnp.dot(h, w2_ref[...], preferred_element_type=jnp.float32) + b2_ref[...]
        h = jnp.maximum(h, 0.0)

        # Output layer (BN2 folded into w3/b3), narrow (out_sz) store.
        out_ref[...] = (
            jnp.dot(h, w3_ref[...], preferred_element_type=jnp.float32) + b3_ref[...]
        )

    return kernel


def tabular_forward(x_cat, x_cont, fused, *, tile_b_max=DEFAULT_TILE_B):
    """TabularModel forward (eval mode). `fused` comes from prepare_fused_params."""
    B = x_cat.shape[0]
    n_cat = fused["n_cat"]
    out_sz = fused["out_sz"]

    # Tile selection: minimize batch padding; force >= 2 grid steps whenever the
    # batch allows it so both v7x TensorCores get work (harmless on v5e/v6e).
    B8 = _round_up(B, 8)
    n_tiles = max(_cdiv(B8, tile_b_max), 2 if B8 >= 16 else 1)
    tile_b = _round_up(_cdiv(B8, n_tiles), 8)
    Bp = tile_b * n_tiles

    # Pack [global category ids (as f32), continuous feats] into ONE input slab.
    ids_g = (x_cat.astype(jnp.int32) + fused["emb_offsets"][None, :]).astype(jnp.float32)
    x_packed = jnp.concatenate([ids_g, x_cont.astype(jnp.float32)], axis=1)
    n_feat = x_packed.shape[1]
    if Bp != B:
        x_packed = jnp.pad(x_packed, ((0, Bp - B), (0, 0)))

    def resident(a):  # full-shape block, same tile every grid step -> VMEM-resident
        return pl.BlockSpec(a.shape, lambda i: (0,) * a.ndim)

    # VMEM budget with lane/sublane padding (every 2-D block pads to (8,128)
    # tiles in VMEM), double-buffering on pipelined operands, and 2x headroom.
    def pad_bytes(r, c):
        return _round_up(r, 8) * _round_up(c, 128) * 4

    act = pad_bytes(tile_b, n_feat) + pad_bytes(tile_b, out_sz)
    wts = (pad_bytes(*fused["t_emb"].shape) + pad_bytes(*fused["w1c"].shape)
           + pad_bytes(*fused["w2"].shape) + pad_bytes(*fused["b2"].shape)
           + pad_bytes(*fused["w3"].shape) + pad_bytes(*fused["b3"].shape))
    tmp = 4 * pad_bytes(tile_b, 128)          # mh / h1 / h2 temporaries + slack
    vmem_limit = int(min(max(2 * (2 * act + 2 * wts + tmp), 16 << 20), 32 << 20))

    kernel = _make_kernel(n_cat, fused["bias_row"])

    out = pl.pallas_call(
        kernel,
        out_shape=jax.ShapeDtypeStruct((Bp, out_sz), jnp.float32),
        grid=(n_tiles,),
        in_specs=[
            pl.BlockSpec((tile_b, n_feat), lambda i: (i, 0)),   # packed inputs
            resident(fused["t_emb"]), resident(fused["w1c"]),
            resident(fused["w2"]), resident(fused["b2"]),
            resident(fused["w3"]), resident(fused["b3"]),
        ],
        out_specs=pl.BlockSpec((tile_b, out_sz), lambda i: (i, 0)),
        compiler_params=pltpu.CompilerParams(
            dimension_semantics=("parallel",),
            vmem_limit_bytes=vmem_limit),
    )(x_packed, fused["t_emb"], fused["w1c"],
      fused["w2"], fused["b2"], fused["w3"], fused["b3"])

    return out if Bp == B else out[:B]


# -----------------------------------------------------------------------------
# Synthetic params + pure-JAX reference (unfolded, eval-mode semantics)
# -----------------------------------------------------------------------------
def make_params(key, emb_szs, n_cont, out_sz, layers):
    keys = jax.random.split(key, 16)
    kidx = iter(range(16))

    emb_tables = [
        jax.random.normal(keys[next(kidx)], (ni, nf), dtype=jnp.float32)
        for ni, nf in emb_szs
    ]
    n_embs = sum(nf for _, nf in emb_szs)
    n_in = n_embs + n_cont
    h1, h2 = layers

    def linear(k, fan_in, fan_out):
        kw, kb = jax.random.split(k)
        bound = 1.0 / jnp.sqrt(fan_in)
        w = jax.random.uniform(kw, (fan_in, fan_out), jnp.float32, -bound, bound)
        b = jax.random.uniform(kb, (1, fan_out), jnp.float32, -bound, bound)
        return w, b

    def bn_params(k, n):
        km, _ = jax.random.split(k)
        return (
            jnp.ones((1, n), jnp.float32),
            jnp.zeros((1, n), jnp.float32),
            0.1 * jax.random.normal(km, (1, n), dtype=jnp.float32),
            jnp.ones((1, n), jnp.float32),
        )

    w1, b1 = linear(keys[next(kidx)], n_in, h1)
    w2, b2 = linear(keys[next(kidx)], h1, h2)
    w3, b3 = linear(keys[next(kidx)], h2, out_sz)
    bng, bnb, bnm, bnv = bn_params(keys[next(kidx)], n_cont)
    g1, be1, m1, v1 = bn_params(keys[next(kidx)], h1)
    g2, be2, m2, v2 = bn_params(keys[next(kidx)], h2)

    return dict(
        emb_tables=emb_tables,
        bn_cont_g=bng, bn_cont_b=bnb, bn_cont_m=bnm, bn_cont_v=bnv,
        w1=w1, b1=b1, bn1_g=g1, bn1_b=be1, bn1_m=m1, bn1_v=v1,
        w2=w2, b2=b2, bn2_g=g2, bn2_b=be2, bn2_m=m2, bn2_v=v2,
        w3=w3, b3=b3,
    )


def _bn(x, gamma, beta, mean, var):
    return (x - mean) * jax.lax.rsqrt(var + EPS) * gamma + beta


def reference_forward(x_cat, x_cont, params):
    embs = [jnp.take(tbl, x_cat[:, i], axis=0)
            for i, tbl in enumerate(params["emb_tables"])]
    x_emb = jnp.concatenate(embs, axis=1)
    xc = _bn(x_cont, params["bn_cont_g"], params["bn_cont_b"],
             params["bn_cont_m"], params["bn_cont_v"])
    x = jnp.concatenate([x_emb, xc], axis=1)
    h = jnp.maximum(x @ params["w1"] + params["b1"], 0.0)
    h = _bn(h, params["bn1_g"], params["bn1_b"], params["bn1_m"], params["bn1_v"])
    h = jnp.maximum(h @ params["w2"] + params["b2"], 0.0)
    h = _bn(h, params["bn2_g"], params["bn2_b"], params["bn2_m"], params["bn2_v"])
    return h @ params["w3"] + params["b3"]


if __name__ == "__main__":
    # Hyperparameters implied by the NYC-taxi classification tutorial:
    #   cat sizes Hour=24, AMorPM=2, Weekday=7 -> emb dims (12, 1, 4)
    cat_szs = [24, 2, 7]
    emb_szs = [(s, min(50, (s + 1) // 2)) for s in cat_szs]   # [(24,12),(2,1),(7,4)]
    n_cont = 6
    out_sz = 2
    layers = (64, 32)
    batch = 64

    key = jax.random.PRNGKey(0)
    kp, kc, kcont = jax.random.split(key, 3)

    params = make_params(kp, emb_szs, n_cont, out_sz, layers)
    fused = prepare_fused_params(params)          # one-time offline folding

    x_cat = jnp.stack(
        [
            jax.random.randint(jax.random.fold_in(kc, i), (batch,), 0, cat_szs[i])
            for i in range(len(cat_szs))
        ],
        axis=1,
    ).astype(jnp.int32)                                        # (B, 3)
    x_cont = jax.random.normal(kcont, (batch, n_cont), dtype=jnp.float32)  # (B, 6)

    out = tabular_forward(x_cat, x_cont, fused)
    out = jax.block_until_ready(out)

    ref = reference_forward(x_cat, x_cont, params)
    assert out.shape == (batch, out_sz)
    assert jnp.allclose(out, ref, atol=1e-4, rtol=1e-4), "mismatch vs JAX reference"

    print("KERNEL_OK")
</pallas_src>

<mosaic_0001>
module attributes {stable_mosaic.version = 11 : i64} {
  func.func @kernel(%arg0: i32, %arg1: memref<32x9xf32, #tpu.memory_space<vmem>>, %arg2: memref<40x64xf32, #tpu.memory_space<vmem>>, %arg3: memref<6x64xf32, #tpu.memory_space<vmem>>, %arg4: memref<64x32xf32, #tpu.memory_space<vmem>>, %arg5: memref<1x32xf32, #tpu.memory_space<vmem>>, %arg6: memref<32x2xf32, #tpu.memory_space<vmem>>, %arg7: memref<1x2xf32, #tpu.memory_space<vmem>>, %arg8: memref<32x2xf32, #tpu.memory_space<vmem>>) attributes {dimension_semantics = [#tpu.dimension_semantics<parallel>], iteration_bounds = array<i64: 2>, scalar_prefetch = 0 : i64, scratch_operands = 0 : i64, tpu.core_type = #tpu.core_type<tc>, window_params = [{transform_indices = @transform_0, window_bounds = array<i64: 32, 9>}, {pipeline_mode = #tpu.pipeline_mode<synchronous>, transform_indices = @transform_1, window_bounds = array<i64: 40, 64>}, {pipeline_mode = #tpu.pipeline_mode<synchronous>, transform_indices = @transform_2, window_bounds = array<i64: 6, 64>}, {pipeline_mode = #tpu.pipeline_mode<synchronous>, transform_indices = @transform_3, window_bounds = array<i64: 64, 32>}, {pipeline_mode = #tpu.pipeline_mode<synchronous>, transform_indices = @transform_4, window_bounds = array<i64: 1, 32>}, {pipeline_mode = #tpu.pipeline_mode<synchronous>, transform_indices = @transform_5, window_bounds = array<i64: 32, 2>}, {pipeline_mode = #tpu.pipeline_mode<synchronous>, transform_indices = @transform_6, window_bounds = array<i64: 1, 2>}, {transform_indices = @transform_7, window_bounds = array<i64: 32, 2>}]} {
    %c0 = arith.constant 0 : index
    %c0_0 = arith.constant 0 : index
    %0 = vector.load %arg1[%c0, %c0_0] : memref<32x9xf32, #tpu.memory_space<vmem>>, vector<32x9xf32>
    %1 = vector.extract_strided_slice %0 {offsets = [0, 0], sizes = [32, 3], strides = [1, 1]} : vector<32x9xf32> to vector<32x3xf32>
    %2 = arith.fptosi %1 : vector<32x3xf32> to vector<32x3xi32>
    %3 = vector.extract_strided_slice %0 {offsets = [0, 3], sizes = [32, 6], strides = [1, 1]} : vector<32x9xf32> to vector<32x6xf32>
    %4 = tpu.iota {dimensions = array<i32: 1>} : vector<32x40xi32>
    %c33_i32 = arith.constant 33 : i32
    %5 = vector.broadcast %c33_i32 : i32 to vector<32x40xi32>
    %6 = arith.cmpi eq, %4, %5 : vector<32x40xi32>
    %7 = vector.extract_strided_slice %2 {offsets = [0, 0], sizes = [32, 1], strides = [1, 1]} : vector<32x3xi32> to vector<32x1xi32>
    %8 = vector.broadcast %7 : vector<32x1xi32> to vector<32x40xi32>
    %9 = arith.cmpi eq, %4, %8 : vector<32x40xi32>
    %10 = arith.ori %6, %9 : vector<32x40xi1>
    %11 = vector.extract_strided_slice %2 {offsets = [0, 1], sizes = [32, 1], strides = [1, 1]} : vector<32x3xi32> to vector<32x1xi32>
    %12 = vector.broadcast %11 : vector<32x1xi32> to vector<32x40xi32>
    %13 = arith.cmpi eq, %4, %12 : vector<32x40xi32>
    %14 = arith.ori %10, %13 : vector<32x40xi1>
    %15 = vector.extract_strided_slice %2 {offsets = [0, 2], sizes = [32, 1], strides = [1, 1]} : vector<32x3xi32> to vector<32x1xi32>
    %16 = vector.broadcast %15 : vector<32x1xi32> to vector<32x40xi32>
    %17 = arith.cmpi eq, %4, %16 : vector<32x40xi32>
    %18 = arith.ori %14, %17 : vector<32x40xi1>
    %19 = arith.extui %18 : vector<32x40xi1> to vector<32x40xi32>
    %20 = arith.sitofp %19 : vector<32x40xi32> to vector<32x40xf32>
    %c0_1 = arith.constant 0 : index
    %c0_2 = arith.constant 0 : index
    %21 = vector.load %arg2[%c0_1, %c0_2] : memref<40x64xf32, #tpu.memory_space<vmem>>, vector<40x64xf32>
    %cst = arith.constant dense<0.000000e+00> : vector<32x64xf32>
    %22 = tpu.matmul %20, %21, %cst {dimension_numbers = #tpu.dot_dimension_numbers<[1], [0], [0], [1], [0, 0, 1, 1], [], []>} : vector<32x40xf32>, vector<40x64xf32>, vector<32x64xf32> -> vector<32x64xf32>
    %c0_3 = arith.constant 0 : index
    %c0_4 = arith.constant 0 : index
    %23 = vector.load %arg3[%c0_3, %c0_4] : memref<6x64xf32, #tpu.memory_space<vmem>>, vector<6x64xf32>
    %cst_5 = arith.constant dense<0.000000e+00> : vector<32x64xf32>
    %24 = tpu.matmul %3, %23, %cst_5 {dimension_numbers = #tpu.dot_dimension_numbers<[1], [0], [0], [1], [0, 0, 1, 1], [], []>} : vector<32x6xf32>, vector<6x64xf32>, vector<32x64xf32> -> vector<32x64xf32>
    %25 = arith.addf %22, %24 : vector<32x64xf32>
    %cst_6 = arith.constant 0.000000e+00 : f32
    %26 = vector.broadcast %cst_6 : f32 to vector<32x64xf32>
    %27 = arith.maximumf %25, %26 : vector<32x64xf32>
    %c0_7 = arith.constant 0 : index
    %c0_8 = arith.constant 0 : index
    %28 = vector.load %arg4[%c0_7, %c0_8] : memref<64x32xf32, #tpu.memory_space<vmem>>, vector<64x32xf32>
    %cst_9 = arith.constant dense<0.000000e+00> : vector<32x32xf32>
    %29 = tpu.matmul %27, %28, %cst_9 {dimension_numbers = #tpu.dot_dimension_numbers<[1], [0], [0], [1], [0, 0, 1, 1], [], []>} : vector<32x64xf32>, vector<64x32xf32>, vector<32x32xf32> -> vector<32x32xf32>
    %c0_10 = arith.constant 0 : index
    %c0_11 = arith.constant 0 : index
    %30 = vector.load %arg5[%c0_10, %c0_11] : memref<1x32xf32, #tpu.memory_space<vmem>>, vector<1x32xf32>
    %31 = vector.broadcast %30 : vector<1x32xf32> to vector<32x32xf32>
    %32 = arith.addf %29, %31 : vector<32x32xf32>
    %cst_12 = arith.constant 0.000000e+00 : f32
    %33 = vector.broadcast %cst_12 : f32 to vector<32x32xf32>
    %34 = arith.maximumf %32, %33 : vector<32x32xf32>
    %c0_13 = arith.constant 0 : index
    %c0_14 = arith.constant 0 : index
    %35 = vector.load %arg6[%c0_13, %c0_14] : memref<32x2xf32, #tpu.memory_space<vmem>>, vector<32x2xf32>
    %cst_15 = arith.constant dense<0.000000e+00> : vector<32x2xf32>
    %36 = tpu.matmul %34, %35, %cst_15 {dimension_numbers = #tpu.dot_dimension_numbers<[1], [0], [0], [1], [0, 0, 1, 1], [], []>} : vector<32x32xf32>, vector<32x2xf32>, vector<32x2xf32> -> vector<32x2xf32>
    %c0_16 = arith.constant 0 : index
    %c0_17 = arith.constant 0 : index
    %37 = vector.load %arg7[%c0_16, %c0_17] : memref<1x2xf32, #tpu.memory_space<vmem>>, vector<1x2xf32>
    %38 = vector.broadcast %37 : vector<1x2xf32> to vector<32x2xf32>
    %39 = arith.addf %36, %38 : vector<32x2xf32>
    %c0_18 = arith.constant 0 : index
    %c0_19 = arith.constant 0 : index
    %40 = vector.load %arg8[%c0_18, %c0_19] : memref<32x2xf32, #tpu.memory_space<vmem>>, vector<32x2xf32>
    tpu.vector_store %arg8[%c0_18, %c0_19], %39 {strides = array<i32>} : memref<32x2xf32, #tpu.memory_space<vmem>>, vector<32x2xf32>,
    return
  }
  func.func @transform_0(%arg0: i32) -> (i32, i32) {
    %c0_i32 = arith.constant 0 : i32
    %c0_i32_0 = arith.constant 0 : i32
    return %arg0, %c0_i32 : i32, i32
  }
  func.func @transform_1(%arg0: i32) -> (i32, i32) {
    %c0_i32 = arith.constant 0 : i32
    %c0_i32_0 = arith.constant 0 : i32
    %c0_i32_1 = arith.constant 0 : i32
    return %c0_i32, %c0_i32_0 : i32, i32
  }
  func.func @transform_2(%arg0: i32) -> (i32, i32) {
    %c0_i32 = arith.constant 0 : i32
    %c0_i32_0 = arith.constant 0 : i32
    %c0_i32_1 = arith.constant 0 : i32
    return %c0_i32, %c0_i32_0 : i32, i32
  }
  func.func @transform_3(%arg0: i32) -> (i32, i32) {
    %c0_i32 = arith.constant 0 : i32
    %c0_i32_0 = arith.constant 0 : i32
    %c0_i32_1 = arith.constant 0 : i32
    return %c0_i32, %c0_i32_0 : i32, i32
  }
  func.func @transform_4(%arg0: i32) -> (i32, i32) {
    %c0_i32 = arith.constant 0 : i32
    %c0_i32_0 = arith.constant 0 : i32
    %c0_i32_1 = arith.constant 0 : i32
    return %c0_i32, %c0_i32_0 : i32, i32
  }
  func.func @transform_5(%arg0: i32) -> (i32, i32) {
    %c0_i32 = arith.constant 0 : i32
    %c0_i32_0 = arith.constant 0 : i32
    %c0_i32_1 = arith.constant 0 : i32
    return %c0_i32, %c0_i32_0 : i32, i32
  }
  func.func @transform_6(%arg0: i32) -> (i32, i32) {
    %c0_i32 = arith.constant 0 : i32
    %c0_i32_0 = arith.constant 0 : i32
    %c0_i32_1 = arith.constant 0 : i32
    return %c0_i32, %c0_i32_0 : i32, i32
  }
  func.func @transform_7(%arg0: i32) -> (i32, i32) {
    %c0_i32 = arith.constant 0 : i32
    %c0_i32_0 = arith.constant 0 : i32
    return %arg0, %c0_i32 : i32, i32
  }
}

</mosaic_0001>

<bundles_post_ra>
// kernel: tpu_custom_call.1
= control target key start
LH: loop header
LB: loop body
LE: loop exit
PB: predicated region body
PF: predicated region fallthrough
CT: control target
= control target key end

     0   :  { %s768_s24 = smov 0   ;;  %s872_s0 = inlined_call_operand.vmem [shape: f32[64,9], index: 0, kind: input, shape index: {}]   ;;  %s873_s1 = inlined_call_operand.vmem [shape: f32[40,64], index: 1, kind: input, shape index: {}]   ;;  %s874_s2 = inlined_call_operand.vmem [shape: f32[6,64], index: 2, kind: input, shape index: {}]   ;;  %s875_s3 = inlined_call_operand.vmem [shape: f32[64,32], index: 3, kind: input, shape index: {}]   ;;  %s876_s4 = inlined_call_operand.vmem [shape: f32[1,32], index: 4, kind: input, shape index: {}]   ;;  %s877_s5 = inlined_call_operand.vmem [shape: f32[32,2], index: 5, kind: input, shape index: {}]   ;;  %s878_s6 = inlined_call_operand.vmem [shape: f32[1,2], index: 6, kind: input, shape index: {}]   ;;  %s879_s7 = inlined_call_operand.vmem [shape: f32[64,2], index: 7, kind: output, shape index: {}]  }
   0x1 LB: > { %s636_s25 = sadd.s32 4294967295, %s721_s24   ;;  %p640_p0 = scmp.ge.s32.totalorder %s721_s24, 1  ;;  %s721_s24 = sphi %s768_s24, %s17_s24  }
   0x2   : > { %p238_p1 = scmp.lt.s32.totalorder %s721_s24, 3 }
   0x4   : > { %p239_p2 = pnand %p640_p0, %p238_p1 }
   0x5   : > { %s641_s26 = sshll.u32 (!%p239_p2), %s636_s25, 2  ;;  %s725_s8 = smov (!%p239_p2), 125  }
   0x6   : > { %242 = sbr.rel (%p239_p2) target bundleno = 575 (0x23f), region = 48  ;;  %p271_p3 = scmp.lt.s32.totalorder (!%p239_p2), %s641_s26, 7 }
   0xb   : > { %v723_v0 = vmov 0   ;;  %v724_v1 = vmov 2   ;;  %s881_s26 = smov (!%p271_p3, %s641_s26), 7  ;;  %v726_v15 = vmov 1   ;;  %v366_v23 = vld [vmem:[%s874_s2] sm:$0x3f]  ;;  %v290_v33 = vlaneseq }
   0xc   : > { %701 = vset.pattern.permute.xlu0 %v723_v0  ;;  %703 = vset.pattern.permute.xlu1 %v724_v1  ;;  %s642_s27 = sshll.u32 %s881_s26, 3  ;;  %vm388_vm4 = vcmask 1045504   ;;  %v365_v24 = vld [vmem:[%s873_s1 + $0x20] sm:$0xff]  ;;  %v364_v25 = vld [vmem:[%s873_s1 + $0x18] sm:$0xff]  ;;  %v363_v26 = vld [vmem:[%s873_s1 + $0x10] sm:$0xff]  ;;  %vm379_vm5 = vcmask 48128  }
   0xd   : > { %704 = vset.pattern.permute.xlu2 %v723_v0  ;;  %s274_s30 = scalar_lea.vmem %s872_s0, %s642_s27  ;;  %649 = vmatpush.msk.msra.mxu0 %vm388_vm4, %v366_v23  ;;  %v362_v27 = vld [vmem:[%s873_s1 + $0x8] sm:$0xff]  ;;  %v361_v28 = vld [vmem:[%s873_s1] sm:$0xff]  ;;  %v291_v36 = vand.u32 127, %v290_v33  ;;  %vm421_vm13 = vcmask 326656   ;;  %v727_v39 = vmov 0.0   ;;  %v474_v52 = vld [vmem:[%s875_s3 + $0x38] sm:$0xff]  ;;  %s280_s11 = scalar_lea.vmem %s879_s7, %s642_s27 }
   0xe   : > { %v282_v2 = vld [vmem:[%s274_s30] sm:$0xff]  ;;  %v283_v3 = vld [vmem:[%s274_s30 + $0x8] sm:$0xff]  ;;  %v284_v12 = vld [vmem:[%s274_s30 + $0x10] sm:$0xff]  ;;  %445 = vmatpush.msra.mxu1 %v365_v24  ;;  %500 = vmatpush.msra.mxu2 %v474_v52 }
   0xf   : > { %371 = vrot.lane.b32.xlu1 %v282_v2, %s725_s8  ;;  %v669_v4 = vceil.f32 %v282_v2  ;;  %v670_v5 = vfloor.f32 %v282_v2  ;;  %vm668_vm0 = vcmp.lt.s32.totalorder %v282_v2, 0  ;;  %vm673_vm1 = vcmp.lt.s32.totalorder %v283_v3, 0  ;;  %v285_v17 = vld [vmem:[%s274_s30 + $0x18] sm:$0xff]  ;;  %v473_v53 = vld [vmem:[%s875_s3 + $0x30] sm:$0xff]  ;;  %v472_v54 = vld [vmem:[%s875_s3 + $0x28] sm:$0xff] }
  0x10   : > { %v674_v6 = vceil.f32 %v283_v3  ;;  %v675_v7 = vfloor.f32 %v283_v3  ;;  %v679_v13 = vceil.f32 %v284_v12  ;;  %v680_v14 = vfloor.f32 %v284_v12  ;;  %446 = vmatpush.msra.mxu1 %v364_v25  ;;  %501 = vmatpush.msra.mxu2 %v473_v53  ;;  %v471_v55 = vld [vmem:[%s875_s3 + $0x20] sm:$0xff]  ;;  %v470_v56 = vld [vmem:[%s875_s3 + $0x18] sm:$0xff]  ;;  %v469_v57 = vld [vmem:[%s875_s3 + $0x10] sm:$0xff] }
  0x11   : > { %v671_v8 = vsel %vm668_vm0, %v669_v4, %v670_v5  ;;  %vm678_vm2 = vcmp.lt.s32.totalorder %v284_v12, 0  ;;  %v684_v19 = vceil.f32 %v285_v17  ;;  %v685_v20 = vfloor.f32 %v285_v17  ;;  %v468_v58 = vld [vmem:[%s875_s3 + $0x8] sm:$0xff]  ;;  %v467_v59 = vld [vmem:[%s875_s3] sm:$0xff]  ;;  %v528_v61 = vld [vmem:[%s877_s5 + $0x18] sm:$0xff] }
  0x12   : > { %v672_v9 = vcvt.f32.s32 %v671_v8  ;;  %v676_v10 = vsel %vm673_vm1, %v674_v6, %v675_v7  ;;  %v681_v16 = vsel %vm678_vm2, %v679_v13, %v680_v14  ;;  %vm683_vm3 = vcmp.lt.s32.totalorder %v285_v17, 0  ;;  %447 = vmatpush.msra.mxu1 %v363_v26  ;;  %502 = vmatpush.msra.mxu2 %v472_v54  ;;  %v527_v13 = vld [vmem:[%s877_s5 + $0x10] sm:$0xff]  ;;  %v526_v14 = vld [vmem:[%s877_s5 + $0x8] sm:$0xff] }
  0x13   : > { %v677_v11 = vcvt.f32.s32 %v676_v10  ;;  %v682_v18 = vcvt.f32.s32 %v681_v16  ;;  %v686_v21 = vsel %vm683_vm3, %v684_v19, %v685_v20  ;;  %vm292_vm7 = vcmp.eq.s32.totalorder %v291_v36, 33  ;;  %558 = vmatpush.msra.mxu3 %v528_v61  ;;  %v713_v16 = vld [vmem:[%s876_s4] ss:$0 sm:$0xff] }
  0x14   : > { %294 = vperm.xlu0 %701, %v672_v9   ;;  %v687_v22 = vcvt.f32.s32 %v686_v21  ;;  %448 = vmatpush.msra.mxu1 %v362_v27 }
  0x15   : > { %297 = vperm.xlu2 %704, %v677_v11   ;;  %503 = vmatpush.msra.mxu2 %v471_v55 }
  0x16   : > { %449 = vmatpush.msra.mxu1 %v361_v28  ;;  %559 = vmatpush.msra.mxu3 %v527_v13 }
  0x17   : > { %334 = vperm.xlu1 %703, %v672_v9   ;;  %504 = vmatpush.msra.mxu2 %v470_v56 }
  0x18   : > { %560 = vmatpush.msra.mxu3 %v526_v14 }
  0x19   : > { %505 = vmatpush.msra.mxu2 %v469_v57 }
  0x1b   : > { %506 = vmatpush.msra.mxu2 %v468_v58 }
  0x1c   : > { %702 = vset.pattern.permute.xlu0 %v726_v15 }
  0x1d   : > { %314 = vperm.xlu0 %702, %v672_v9   ;;  %705 = vset.pattern.permute.xlu2 %v726_v15 }
  0x1e   : > { %317 = vperm.xlu2 %705, %v677_v11   ;;  %507 = vmatpush.msra.mxu2 %v467_v59 }
  0x1f   : > { %337 = vperm.xlu1 %703, %v677_v11  }
  0x25   : > { %706 = vset.pattern.permute.xlu0 %v723_v0 }
  0x26   : > { %300 = vperm.xlu0 %706, %v682_v18   ;;  %373 = vrot.lane.b32.xlu2 %v283_v3, %s725_s8 }
  0x27   : > { %707 = vset.pattern.permute.xlu1 %v726_v15  ;;  %708 = vset.pattern.permute.xlu2 %v724_v1 }
  0x28   : > { %320 = vperm.xlu1 %707, %v682_v18  }
  0x2e   : > { %710 = vset.pattern.permute.xlu0 %v726_v15  ;;  %340 = vperm.xlu2 %708, %v682_v18   ;;  %v525_v15 = vld [vmem:[%s877_s5] sm:$0xff] }
  0x2f   : > { %323 = vperm.xlu0 %710, %v687_v22   ;;  %561 = vmatpush.msra.mxu3 %v525_v15 }
  0x30   : > { %375 = vrot.lane.b32.xlu1 %v284_v12, %s725_s8 }
  0x31   : > { %711 = vset.pattern.permute.xlu1 %v724_v1 }
  0x36   : > { %709 = vset.pattern.permute.xlu2 %v723_v0 }
  0x37   : > { %303 = vperm.xlu2 %709, %v687_v22   ;;  %712 = vset.pattern.permute.xlu0 %v724_v1 }
  0x38   : > { %343 = vperm.xlu1 %711, %v687_v22  }
  0x3f   : > { %377 = vrot.lane.b32.xlu2 %v285_v17, %s725_s8 }
  0x6f   : > { %v298_v29 = vpop.permute.xlu2 %297 }
  0x70   : > { %vm306_vm10 = vcmp.eq.s32.totalorder %v291_v36, %v298_v29  ;;  %v714_v29 = vld [vmem:[%s878_s6] ss:$0 sm:$0xff] }
  0x71   : > { %vm310_vm15 = vmor %vm292_vm7, %vm306_vm10 }
  0x78   : > { %v318_v30 = vpop.permute.xlu2 %317 }
  0x79   : > { %vm326_vm0 = vcmp.eq.s32.totalorder %v291_v36, %v318_v30 }
  0x7a   : > { %vm330_vm2 = vmor %vm310_vm15, %vm326_vm0 }
  0x80   : > { %v374_v34 = vpop.permute.xlu2 %373 }
  0x81   : > { %v372_v31 = vpop.permute.xlu1 %371 }
  0x82   : > { %650 = vmatmul.msk.f32.vlgmr.msra.gmra.mxu0 %vm379_vm5, %v372_v31 }
  0x86   : > { %v295_v32 = vpop.permute.xlu0 %294 }
  0x87   : > { %vm305_vm6 = vcmp.eq.s32.totalorder %v291_v36, %v295_v32 }
  0x88   : > { %vm309_vm8 = vmor %vm292_vm7, %vm305_vm6  ;;  %v341_v41 = vpop.permute.xlu2 %340 }
  0x89   : > { %v335_v35 = vpop.permute.xlu1 %334 }
  0x8a   : > { %651 = vmatmul.msk.f32.gmra.mxu0 %vm379_vm5, %v374_v34  ;;  %vm345_vm11 = vcmp.eq.s32.totalorder %v291_v36, %v335_v35 }
  0x8f   : > { %v315_v37 = vpop.permute.xlu0 %314 }
  0x90   : > { %vm325_vm9 = vcmp.eq.s32.totalorder %v291_v36, %v315_v37 }
  0x91   : > { %vm329_vm12 = vmor %vm309_vm8, %vm325_vm9  ;;  %v338_v38 = vpop.permute.xlu1 %337  ;;  %v304_v45 = vpop.permute.xlu2 %303 }
  0x92   : > { %vm349_vm14 = vmor %vm329_vm12, %vm345_vm11  ;;  %vm346_vm1 = vcmp.eq.s32.totalorder %v291_v36, %v338_v38  ;;  %vm347_vm11 = vcmp.eq.s32.totalorder %v291_v36, %v341_v41  ;;  %vm308_vm12 = vcmp.eq.s32.totalorder %v291_v36, %v304_v45 }
  0x93   : > { %v645_v40 = vsel %vm349_vm14, 1.0, %v727_v39  ;;  %vm350_vm3 = vmor %vm330_vm2, %vm346_vm1 }
  0x94   : > { %654 = vmatmul.msk.f32.vlgmr.msra.gmra.mxu1 %vm421_vm13, %v645_v40  ;;  %v646_v44 = vsel %vm350_vm3, 1.0, %v727_v39  ;;  %vm312_vm14 = vmor %vm292_vm7, %vm308_vm12 }
  0x98   : > { %v301_v42 = vpop.permute.xlu0 %300 }
  0x99   : > { %vm307_vm4 = vcmp.eq.s32.totalorder %v291_v36, %v301_v42  ;;  %v378_v49 = vpop.permute.xlu2 %377 }
  0x9a   : > { %vm311_vm6 = vmor %vm292_vm7, %vm307_vm4  ;;  %v321_v43 = vpop.permute.xlu1 %320  ;;  %vm533_vm7 = vcmask 261120  }
  0x9b   : > { %vm327_vm8 = vcmp.eq.s32.totalorder %v291_v36, %v321_v43 }
  0x9c   : > { %655 = vmatmul.msk.f32.gmra.mxu1 %vm421_vm13, %v646_v44  ;;  %vm331_vm9 = vmor %vm311_vm6, %vm327_vm8 }
  0x9d   : > { %vm351_vm10 = vmor %vm331_vm9, %vm347_vm11 }
  0x9e   : > { %v647_v47 = vsel %vm351_vm10, 1.0, %v727_v39 }
  0xa1   : > { %v324_v48 = vpop.permute.xlu0 %323 }
  0xa2   : > { %v376_v46 = vpop.permute.xlu1 %375  ;;  %vm328_vm15 = vcmp.eq.s32.totalorder %v291_v36, %v324_v48 }
  0xa3   : > { %652 = vmatmul.msk.f32.gmra.mxu0 %vm379_vm5, %v376_v46  ;;  %vm332_vm0 = vmor %vm312_vm14, %vm328_vm15 }
  0xa4   : > { %656 = vmatmul.msk.f32.gmra.mxu1 %vm421_vm13, %v647_v47 }
  0xaa   : > { %v344_v50 = vpop.permute.xlu1 %343 }
  0xab   : > { %vm348_vm1 = vcmp.eq.s32.totalorder %v291_v36, %v344_v50  ;;  %653 = vmatmul.msk.f32.gmra.mxu0 %vm379_vm5, %v378_v49  ;;  %vm479_vm5 = vcmask 523264  }
  0xac   : > { %vm352_vm2 = vmor %vm332_vm0, %vm348_vm1 }
  0xad   : > { %v648_v51 = vsel %vm352_vm2, 1.0, %v727_v39 }
  0xae   : > { %657 = vmatmul.msk.f32.gmra.mxu1 %vm421_vm13, %v648_v51  ;;  %vm575_vm13 = vcmask 15360  }
  0xff   : > { %v409_v60 = vpop.f32.mrf.mxu0 }
 0x107   : > { %v412_v1 = vpop.f32.mrf.mxu0 }
 0x111   : > { %v451_v62 = vpop.f32.mrf.mxu1 }
 0x112   : > { %v452_v63 = vadd.f32 %v451_v62, %v409_v60 }
 0x114   : > { %v463_v0 = vmax.f32 %v452_v63, 0.0 }
 0x116   : > { %658 = vmatmul.msk.f32.vlgmr.msra.gmra.mxu2 %vm479_vm5, %v463_v0 }
 0x119   : > { %v454_v2 = vpop.f32.mrf.mxu1 }
 0x11a   : > { %v455_v3 = vadd.f32 %v454_v2, %v412_v1 }
 0x11c   : > { %v464_v4 = vmax.f32 %v455_v3, 0.0 }
 0x11e   : > { %659 = vmatmul.msk.f32.gmra.mxu2 %vm479_vm5, %v464_v4 }
 0x120   : > { %v415_v5 = vpop.f32.mrf.mxu0 }
 0x121   : > { %v457_v6 = vpop.f32.mrf.mxu1 }
 0x122   : > { %v458_v7 = vadd.f32 %v457_v6, %v415_v5 }
 0x124   : > { %v465_v8 = vmax.f32 %v458_v7, 0.0 }
 0x126   : > { %660 = vmatmul.msk.f32.gmra.mxu2 %vm479_vm5, %v465_v8 }
 0x128   : > { %v418_v9 = vpop.f32.mrf.mxu0 }
 0x12b   : > { %v460_v10 = vpop.f32.mrf.mxu1 }
 0x12c   : > { %v461_v11 = vadd.f32 %v460_v10, %v418_v9 }
 0x12e   : > { %v466_v12 = vmax.f32 %v461_v11, 0.0 }
 0x130   : > { %661 = vmatmul.msk.f32.gmra.mxu2 %vm479_vm5, %v466_v12 }
 0x199   : > { %v509_v17 = vpop.f32.mrf.mxu2 }
 0x19a   : > { %v510_v18 = vadd.f32 %v713_v16, %v509_v17 }
 0x19c   : > { %v521_v19 = vmax.f32 %v510_v18, 0.0 }
 0x19e   : > { %662 = vmatmul.msk.f32.vlgmr.msra.gmra.mxu3 %vm533_vm7, %v521_v19 }
 0x1a1   : > { %v512_v20 = vpop.f32.mrf.mxu2 }
 0x1a2   : > { %v513_v21 = vadd.f32 %v713_v16, %v512_v20 }
 0x1a4   : > { %v522_v22 = vmax.f32 %v513_v21, 0.0 }
 0x1a6   : > { %663 = vmatmul.msk.f32.gmra.mxu3 %vm533_vm7, %v522_v22 }
 0x1a9   : > { %v515_v23 = vpop.f32.mrf.mxu2 }
 0x1aa   : > { %v516_v24 = vadd.f32 %v713_v16, %v515_v23 }
 0x1ac   : > { %v523_v25 = vmax.f32 %v516_v24, 0.0 }
 0x1ae   : > { %664 = vmatmul.msk.f32.gmra.mxu3 %vm533_vm7, %v523_v25 }
 0x1b3   : > { %v518_v26 = vpop.f32.mrf.mxu2 }
 0x1b4   : > { %v519_v27 = vadd.f32 %v713_v16, %v518_v26 }
 0x1b6   : > { %v524_v28 = vmax.f32 %v519_v27, 0.0 }
 0x1b8   : > { %665 = vmatmul.msk.f32.gmra.mxu3 %vm533_vm7, %v524_v28 }
 0x221   : > { %v563_v30 = vpop.f32.mrf.mxu3 }
 0x222   : > { %v564_v31 = vadd.f32 %v714_v29, %v563_v30 }
 0x224   : > { %576 = vst.msk [vmem:[%s280_s11] sm:$0xff] %vm575_vm13, %v564_v31 }
 0x229   : > { %v566_v32 = vpop.f32.mrf.mxu3 }
 0x22a   : > { %v567_v33 = vadd.f32 %v714_v29, %v566_v32 }
 0x22c   : > { %577 = vst.msk [vmem:[%s280_s11 + $0x8] sm:$0xff] %vm575_vm13, %v567_v33 }
 0x231   : > { %v569_v34 = vpop.f32.mrf.mxu3 }
 0x232   : > { %v570_v35 = vadd.f32 %v714_v29, %v569_v34 }
 0x234   : > { %578 = vst.msk [vmem:[%s280_s11 + $0x10] sm:$0xff] %vm575_vm13, %v570_v35 }
 0x23b   : > { %v572_v36 = vpop.f32.mrf.mxu3 }
 0x23c   : > { %v573_v37 = vadd.f32 %v714_v29, %v572_v36 }
 0x23e   : > { %579 = vst.msk [vmem:[%s280_s11 + $0x18] sm:$0xff] %vm575_vm13, %v573_v37 }
 0x23f PF: > { %s17_s24 = sadd.s32 1, %s721_s24  }
 0x240   : > { %p14_p4 = scmp.ge.s32.totalorder %s17_s24, 4  }
 0x242   :  { %16 = sbr.rel (!%p14_p4) target bundleno = 1 (0x1), region = 78 }

</bundles_post_ra>
